<compile_context>
chip_gen: v7x
topology: tpu7x:2x2x1
jax: 0.10.0
libtpu: 0.0.40
codegen_flags: <defaults>
</compile_context>

<pallas_src>
import functools
import math

import jax
import jax.numpy as jnp
from jax.experimental import pallas as pl
from jax.experimental.pallas import tpu as pltpu


_TARGET_TILE_BYTES = 2 << 20  # ~2 MiB per operand tile


def _pick_row_tile(rows, row_bytes, target_bytes=_TARGET_TILE_BYTES):
    """Rows per block: multiple of 8 targeting ~target_bytes, or all rows."""
    t = max(8, (target_bytes // max(int(row_bytes), 1)) // 8 * 8)
    return rows if t >= rows else t


def _flat2d(total, h):
    """Lane-dense 2-D view for elementwise work; falls back to (N, h)."""
    for lane_w in (4096, 2048, 1024, 512, 256, 128):
        if total % lane_w == 0:
            return total // lane_w, lane_w
    return total // h, h


# --------------------------------------------------------------------------
# Kernel 1: pre-LayerNorm   y = gamma * (x - mean) / (std + eps) + beta
# (std is the *unbiased* std, matching torch.Tensor.std default)
# --------------------------------------------------------------------------
def _pre_ln_kernel(x_ref, g_ref, b_ref, o_ref, *, eps: float):
    x = x_ref[...].astype(jnp.float32)                # (TB, H)
    h = x.shape[-1]
    mean = jnp.mean(x, axis=-1, keepdims=True)
    diff = x - mean
    var = jnp.sum(diff * diff, axis=-1, keepdims=True) * (1.0 / (h - 1))
    inv = 1.0 / (jnp.sqrt(var) + jnp.float32(eps))    # (TB, 1) column only
    g = g_ref[...].astype(jnp.float32)
    b = b_ref[...].astype(jnp.float32)
    o_ref[...] = (g * diff * inv + b).astype(o_ref.dtype)


# --------------------------------------------------------------------------
# Kernel 2: residual + inverted dropout   out = x + dropout(y)
# Randomness = stateless hash of (seed, global element index); keep decision
# done as a uint32 threshold compare (no float convert / divide per element).
# --------------------------------------------------------------------------
def _residual_dropout_kernel(x_ref, y_ref, seed_ref, o_ref, *,
                             rate: float, training: bool,
                             tile_rows: int, lane_w: int):
    x = x_ref[...].astype(jnp.float32)                # (TB, L)
    y = y_ref[...].astype(jnp.float32)
    if training and rate > 0.0:
        shape = x.shape
        row0 = pl.program_id(0) * tile_rows
        r = jax.lax.broadcasted_iota(jnp.int32, shape, 0)
        c = jax.lax.broadcasted_iota(jnp.int32, shape, 1)
        gid = (row0 + r) * jnp.int32(lane_w) + c      # global flat index
        h = gid.astype(jnp.uint32)
        h = h + seed_ref[0].astype(jnp.uint32) * jnp.uint32(0x9E3779B1)
        # xxhash/murmur-style avalanche (good bit mixing for dropout masks)
        h = (h ^ (h >> 15)) * jnp.uint32(0x85EBCA77)
        h = (h ^ (h >> 13)) * jnp.uint32(0xC2B2AE3D)
        h = h ^ (h >> 16)
        threshold = min(int(round(rate * 4294967296.0)), 4294967295)
        keep = h >= jnp.uint32(threshold)             # P(keep) = 1 - rate
        y = jnp.where(keep, y * jnp.float32(1.0 / (1.0 - rate)),
                      jnp.float32(0.0))
    o_ref[...] = (x + y).astype(o_ref.dtype)


# --------------------------------------------------------------------------
# Wrappers
# --------------------------------------------------------------------------
def _layernorm_rows(x2d, g2d, b2d, eps):
    n, h = x2d.shape
    tile = _pick_row_tile(n, h * jnp.dtype(x2d.dtype).itemsize)
    kern = functools.partial(_pre_ln_kernel, eps=float(eps))
    return pl.pallas_call(
        kern,
        out_shape=jax.ShapeDtypeStruct((n, h), x2d.dtype),
        grid=(pl.cdiv(n, tile),),
        in_specs=[
            pl.BlockSpec((tile, h), lambda i: (i, 0)),
            pl.BlockSpec((1, h), lambda i: (0, 0)),
            pl.BlockSpec((1, h), lambda i: (0, 0)),
        ],
        out_specs=pl.BlockSpec((tile, h), lambda i: (i, 0)),
        compiler_params=pltpu.CompilerParams(
            dimension_semantics=("parallel",)),
    )(x2d, g2d, b2d)


def _residual_dropout(x, y, seed, rate, training):
    orig_shape = x.shape
    h = orig_shape[-1]
    total = x.size
    rows, lane_w = _flat2d(total, h)                  # lane-dense view
    x2 = x.reshape(rows, lane_w)
    y2 = y.reshape(rows, lane_w)
    tile = _pick_row_tile(rows, lane_w * jnp.dtype(x2.dtype).itemsize)
    seed_arr = jnp.asarray([seed], dtype=jnp.int32)
    aliases = {1: 0} if y2.dtype == x2.dtype else {}  # donate sublayer output
    kern = functools.partial(_residual_dropout_kernel, rate=float(rate),
                             training=bool(training), tile_rows=tile,
                             lane_w=lane_w)
    out = pl.pallas_call(
        kern,
        out_shape=jax.ShapeDtypeStruct((rows, lane_w), x.dtype),
        grid=(pl.cdiv(rows, tile),),
        in_specs=[
            pl.BlockSpec((tile, lane_w), lambda i: (i, 0)),
            pl.BlockSpec((tile, lane_w), lambda i: (i, 0)),
            pl.BlockSpec(memory_space=pltpu.MemorySpace.SMEM),
        ],
        out_specs=pl.BlockSpec((tile, lane_w), lambda i: (i, 0)),
        compiler_params=pltpu.CompilerParams(
            dimension_semantics=("parallel",)),
        input_output_aliases=aliases,
    )(x2, y2, seed_arr)
    return out.reshape(orig_shape)


def sublayer_connection(x, gamma, beta, sublayer, *, dropout_rate=0.1,
                        eps=1e-6, training=False, seed=0):
    """Pallas TPU forward of SublayerConnection: x + dropout(sublayer(norm(x)))."""
    orig_shape = x.shape
    h = orig_shape[-1]
    assert h >= 2, "LayerNorm with unbiased std needs features >= 2"
    x2d = x.reshape(-1, h)
    g2d = gamma.reshape(1, h)
    b2d = beta.reshape(1, h)

    normed = _layernorm_rows(x2d, g2d, b2d, eps).reshape(orig_shape)
    # TODO(synk): `sublayer` is an arbitrary user callable (as in the PyTorch
    # module); it runs as plain JAX between the two Pallas kernels (fusing the
    # LN into the sublayer's first matmul would need a specialized kernel).
    y = sublayer(normed)

    return _residual_dropout(x, y, seed, dropout_rate, training)


# --------------------------------------------------------------------------
# Pure-JAX reference (mirrors the PyTorch forward exactly, eval mode)
# --------------------------------------------------------------------------
def _layernorm_ref(x, gamma, beta, eps):
    mean = x.mean(-1, keepdims=True)
    std = jnp.std(x, axis=-1, keepdims=True, ddof=1)   # unbiased, like torch
    return gamma * (x - mean) / (std + eps) + beta


def _reference_eval(x, gamma, beta, sublayer, eps=1e-6):
    return x + sublayer(_layernorm_ref(x, gamma, beta, eps))


if __name__ == "__main__":
    key = jax.random.PRNGKey(0)
    kx, kg, kb, kw = jax.random.split(key, 4)

    B, S, H = 2, 8, 32
    x = jax.random.normal(kx, (B, S, H), dtype=jnp.float32)
    gamma = 1.0 + 0.1 * jax.random.normal(kg, (H,), dtype=jnp.float32)
    beta = 0.1 * jax.random.normal(kb, (H,), dtype=jnp.float32)

    # Example sublayer: a small linear + tanh (plain JAX callable).
    W = jax.random.normal(kw, (H, H), dtype=jnp.float32) / math.sqrt(H)
    sublayer = lambda t: jnp.tanh(jnp.dot(t, W))

    # ---- eval mode (dropout disabled): exact match to the module ----------
    out_eval = sublayer_connection(x, gamma, beta, sublayer,
                                   dropout_rate=0.1, training=False)
    out_eval = jax.block_until_ready(out_eval)
    ref = _reference_eval(x, gamma, beta, sublayer)
    assert out_eval.shape == (B, S, H), out_eval.shape
    assert out_eval.dtype == jnp.float32, out_eval.dtype
    assert jnp.allclose(out_eval, ref, atol=1e-4, rtol=1e-4), "eval mismatch"

    # ---- training mode: each element is either x (dropped) or x + y/(1-p) -
    p = 0.5
    out_train = sublayer_connection(x, gamma, beta, sublayer,
                                    dropout_rate=p, training=True, seed=123)
    out_train = jax.block_until_ready(out_train)
    y_ref = sublayer(_layernorm_ref(x, gamma, beta, 1e-6))
    kept = x + y_ref / (1.0 - p)
    is_x = jnp.isclose(out_train, x, atol=1e-4)
    is_kept = jnp.isclose(out_train, kept, atol=1e-4)
    assert bool(jnp.all(is_x | is_kept)), "training-mode dropout structure mismatch"
    assert bool(jnp.all(jnp.isfinite(out_train)))
    # mask should actually mix keeps and drops at p=0.5 (loose bounds)
    frac_dropped = jnp.mean((is_x & ~is_kept).astype(jnp.float32))
    assert 0.15 < float(frac_dropped) < 0.85, float(frac_dropped)

    print("KERNEL_OK")
</pallas_src>

<mosaic_0001>
module attributes {stable_mosaic.version = 11 : i64} {
  func.func @_pre_ln_kernel(%arg0: i32, %arg1: memref<16x32xf32, #tpu.memory_space<vmem>>, %arg2: memref<1x32xf32, #tpu.memory_space<vmem>>, %arg3: memref<1x32xf32, #tpu.memory_space<vmem>>, %arg4: memref<16x32xf32, #tpu.memory_space<vmem>>) attributes {dimension_semantics = [#tpu.dimension_semantics<parallel>], iteration_bounds = array<i64: 1>, scalar_prefetch = 0 : i64, scratch_operands = 0 : i64, tpu.core_type = #tpu.core_type<tc>, window_params = [{transform_indices = @transform_0, window_bounds = array<i64: 16, 32>}, {pipeline_mode = #tpu.pipeline_mode<synchronous>, transform_indices = @transform_1, window_bounds = array<i64: 1, 32>}, {pipeline_mode = #tpu.pipeline_mode<synchronous>, transform_indices = @transform_2, window_bounds = array<i64: 1, 32>}, {transform_indices = @transform_3, window_bounds = array<i64: 16, 32>}]} {
    %c0 = arith.constant 0 : index
    %c0_0 = arith.constant 0 : index
    %0 = vector.load %arg1[%c0, %c0_0] : memref<16x32xf32, #tpu.memory_space<vmem>>, vector<16x32xf32>
    %cst = arith.constant dense<0.000000e+00> : vector<16xf32>
    %1 = vector.multi_reduction <add>, %0, %cst [1] : vector<16x32xf32> to vector<16xf32>
    %2 = vector.shape_cast %1 : vector<16xf32> to vector<16x1xf32>
    %cst_1 = arith.constant 3.200000e+01 : f32
    %3 = vector.broadcast %cst_1 : f32 to vector<16x1xf32>
    %4 = arith.divf %2, %3 : vector<16x1xf32>
    %5 = vector.broadcast %4 : vector<16x1xf32> to vector<16x32xf32>
    %6 = arith.subf %0, %5 : vector<16x32xf32>
    %7 = arith.mulf %6, %6 : vector<16x32xf32>
    %cst_2 = arith.constant dense<0.000000e+00> : vector<16xf32>
    %8 = vector.multi_reduction <add>, %7, %cst_2 [1] : vector<16x32xf32> to vector<16xf32>
    %9 = vector.shape_cast %8 : vector<16xf32> to vector<16x1xf32>
    %cst_3 = arith.constant 0.0322580636 : f32
    %10 = vector.broadcast %cst_3 : f32 to vector<16x1xf32>
    %11 = arith.mulf %9, %10 : vector<16x1xf32>
    %12 = math.sqrt %11 : vector<16x1xf32>
    %cst_4 = arith.constant 9.99999997E-7 : f32
    %13 = vector.broadcast %cst_4 : f32 to vector<16x1xf32>
    %14 = arith.addf %12, %13 : vector<16x1xf32>
    %cst_5 = arith.constant 1.000000e+00 : f32
    %15 = vector.broadcast %cst_5 : f32 to vector<16x1xf32>
    %16 = arith.divf %15, %14 : vector<16x1xf32>
    %c0_6 = arith.constant 0 : index
    %c0_7 = arith.constant 0 : index
    %17 = vector.load %arg2[%c0_6, %c0_7] : memref<1x32xf32, #tpu.memory_space<vmem>>, vector<1x32xf32>
    %c0_8 = arith.constant 0 : index
    %c0_9 = arith.constant 0 : index
    %18 = vector.load %arg3[%c0_8, %c0_9] : memref<1x32xf32, #tpu.memory_space<vmem>>, vector<1x32xf32>
    %19 = vector.broadcast %17 : vector<1x32xf32> to vector<16x32xf32>
    %20 = arith.mulf %19, %6 : vector<16x32xf32>
    %21 = vector.broadcast %16 : vector<16x1xf32> to vector<16x32xf32>
    %22 = arith.mulf %20, %21 : vector<16x32xf32>
    %23 = vector.broadcast %18 : vector<1x32xf32> to vector<16x32xf32>
    %24 = arith.addf %22, %23 : vector<16x32xf32>
    %c0_10 = arith.constant 0 : index
    %c0_11 = arith.constant 0 : index
    %25 = vector.load %arg4[%c0_10, %c0_11] : memref<16x32xf32, #tpu.memory_space<vmem>>, vector<16x32xf32>
    tpu.vector_store %arg4[%c0_10, %c0_11], %24 {strides = array<i32>} : memref<16x32xf32, #tpu.memory_space<vmem>>, vector<16x32xf32>,
    return
  }
  func.func @transform_0(%arg0: i32) -> (i32, i32) {
    %c0_i32 = arith.constant 0 : i32
    %c0_i32_0 = arith.constant 0 : i32
    return %arg0, %c0_i32 : i32, i32
  }
  func.func @transform_1(%arg0: i32) -> (i32, i32) {
    %c0_i32 = arith.constant 0 : i32
    %c0_i32_0 = arith.constant 0 : i32
    %c0_i32_1 = arith.constant 0 : i32
    return %c0_i32, %c0_i32_0 : i32, i32
  }
  func.func @transform_2(%arg0: i32) -> (i32, i32) {
    %c0_i32 = arith.constant 0 : i32
    %c0_i32_0 = arith.constant 0 : i32
    %c0_i32_1 = arith.constant 0 : i32
    return %c0_i32, %c0_i32_0 : i32, i32
  }
  func.func @transform_3(%arg0: i32) -> (i32, i32) {
    %c0_i32 = arith.constant 0 : i32
    %c0_i32_0 = arith.constant 0 : i32
    return %arg0, %c0_i32 : i32, i32
  }
}

</mosaic_0001>

<bundles_post_ra>
// kernel: tpu_custom_call.1
= control target key start
LH: loop header
LB: loop body
LE: loop exit
PB: predicated region body
PF: predicated region fallthrough
CT: control target
= control target key end

     0   :  { %8 = vsyncpa [#allocation3], 0  ;;  %s240_s0 = inlined_call_operand.hbm [shape: f32[16,32], index: 0, kind: input, shape index: {}]   ;;  %s241_s1 = inlined_call_operand.vmem [shape: f32[1,32], index: 1, kind: input, shape index: {}]   ;;  %s242_s2 = inlined_call_operand.vmem [shape: f32[1,32], index: 2, kind: input, shape index: {}]   ;;  %s243_s3 = inlined_call_operand.hbm [shape: f32[16,32], index: 3, kind: output, shape index: {}]  }
   0x1   :  { %9 = vsyncpa [#allocation4], 0  ;;  %s174_s12 = smov [#allocation2]   ;;  %s126_s16 = scalar_lea.hbm %s240_s0, 256 }
   0x2   :  { %s15_s13 = sshll.u32 %s174_s12, 4  ;;  %p127_p0 = scmp.ne.s32.totalorder %s240_s0, %s126_s16  ;;  %s16_s13 = int_to_ptr.vmem [resolvable:$true] %s15_s13 }
   0x3   :  { %p130_p1 = scmp.lt.u32.totalorder %s126_s16, %s240_s0 }
   0x5   :  { %p132_p2 = pnand %p130_p1, %p127_p0 }
   0x7   :  { %135 = shalt.err (!%p132_p2)
}
   0x8   :  { %s136_s21 = scalar_lea.vmem %s16_s13, 256  ;;  %p141_p4 = scmp.lt.s32.totalorder %s16_s13, %s16_s13 }
   0x9   :  { %p137_p3 = scmp.ne.s32.totalorder %s16_s13, %s136_s21  ;;  %p142_p5 = scmp.lt.s32.totalorder %s136_s21, %s136_s21 }
   0xb   :  { %p143_p6 = por %p142_p5, %p141_p4 }
   0xd   :  { %p144_p7 = pnand %p143_p6, %p137_p3 }
   0xf   :  { %147 = shalt.err (!%p144_p7)
}
  0x10   :  { %s175_s22 = smov 128   ;;  %s176_s23 = smov 8  }
  0x11   :  { %21 = dma.hbm_to_vmem [thread:$0]  %s240_s0, 256, %s16_s13, [#allocation3], %s175_s22, %s175_s22, %s176_s23  }
  0x12   :  { %170 = dma.done.wait [#allocation3], 256  }
  0x13   :  { %171 = vsyncadd [#allocation3], 4294967040  ;;  %vm31_vm0 = vcmask 261120   ;;  %v29_v0 = vld [vmem:[#allocation2] sm:$0xff]  ;;  %v30_v1 = vld [vmem:[#allocation2 + $0x8] sm:$0xff]  ;;  %s177_s29 = smov [#allocation5]  }
  0x14   :  { %v32_v2 = vsel %vm31_vm0, %v29_v0, 0.0  ;;  %v35_v3 = vsel %vm31_vm0, %v30_v1, 0.0  ;;  %v112_v30 = vld [vmem:[%s241_s1] ss:$0 sm:$0xff]  ;;  %s100_s30 = sshll.u32 %s177_s29, 4  ;;  %s101_s30 = int_to_ptr.vmem [resolvable:$true] %s100_s30 }
  0x15   :  { %33 = vadd.xlane.f32.xlu0 %v32_v2  ;;  %v113_v33 = vld [vmem:[%s242_s2] ss:$0 sm:$0xff]  ;;  %s148_s1 = scalar_lea.vmem %s101_s30, 256  ;;  %p153_p9 = scmp.lt.s32.totalorder %s101_s30, %s101_s30 }
  0x16   :  { %p149_p8 = scmp.ne.s32.totalorder %s101_s30, %s148_s1  ;;  %p154_p10 = scmp.lt.s32.totalorder %s148_s1, %s148_s1 }
  0x18   :  { %p155_p11 = por %p154_p10, %p153_p9 }
  0x19   :  { %36 = vadd.xlane.f32.xlu0 %v35_v3 }
  0x1a   :  { %p156_p12 = pnand %p155_p11, %p149_p8 }
  0xa2   :  { %v34_v4 = vpop.xlane.xlu0 %33 }
  0xa3   :  { %v39_v5 = vmul.f32 0.03125, %v34_v4 }
  0xa5   :  { %v41_v6 = vsub.f32 %v29_v0, %v39_v5 }
  0xa6   :  { %v37_v7 = vpop.xlane.xlu0 %36 }
  0xa7   :  { %v40_v8 = vmul.f32 0.03125, %v37_v7  ;;  %v43_v9 = vmul.f32 %v41_v6, %v41_v6  ;;  %v81_v31 = vmul.f32 %v112_v30, %v41_v6 }
  0xa9   :  { %v42_v10 = vsub.f32 %v30_v1, %v40_v8  ;;  %v45_v11 = vsel %vm31_vm0, %v43_v9, 0.0 }
  0xaa   :  { %46 = vadd.xlane.f32.xlu1 %v45_v11 }
  0xab   :  { %v44_v12 = vmul.f32 %v42_v10, %v42_v10  ;;  %v82_v35 = vmul.f32 %v112_v30, %v42_v10 }
  0xad   :  { %v48_v13 = vsel %vm31_vm0, %v44_v12, 0.0 }
  0xae   :  { %49 = vadd.xlane.f32.xlu1 %v48_v13 }
 0x137   :  { %v47_v14 = vpop.xlane.xlu1 %46 }
 0x138   :  { %v51_v15 = vmul.f32 0.032258064, %v47_v14 }
 0x13a   :  { %118 = vrsqrt.f32 %v51_v15  ;;  %vm55_vm1 = vcmp.eq.f32.partialorder %v51_v15, inf  ;;  %v58_v20 = vand.u32 2147483648, %v51_v15  ;;  %vm57_vm2 = vcmp.eq.f32.partialorder %v51_v15, 0.0 }
 0x13b   :  { %v50_v16 = vpop.xlane.xlu1 %49 }
 0x13c   :  { %v52_v17 = vmul.f32 0.032258064, %v50_v16 }
 0x13e   :  { %120 = vrsqrt.f32 %v52_v17  ;;  %vm62_vm3 = vcmp.eq.f32.partialorder %v52_v17, inf  ;;  %v65_v26 = vand.u32 2147483648, %v52_v17  ;;  %vm64_vm4 = vcmp.eq.f32.partialorder %v52_v17, 0.0 }
 0x144   :  { %v119_v18 = vpop.eup %118 }
 0x145   :  { %v54_v19 = vmul.f32 %v119_v18, %v51_v15 }
 0x147   :  { %v56_v21 = vsel %vm55_vm1, %v51_v15, %v54_v19 }
 0x148   :  { %v121_v22 = vpop.eup %120  ;;  %v59_v23 = vsel %vm57_vm2, %v58_v20, %v56_v21 }
 0x149   :  { %v67_v24 = vadd.f32 1e-06, %v59_v23  ;;  %v61_v25 = vmul.f32 %v121_v22, %v52_v17 }
 0x14b   :  { %v63_v27 = vsel %vm62_vm3, %v52_v17, %v61_v25  ;;  %122 = vrcp.f32 %v67_v24 }
 0x14c   :  { %v66_v28 = vsel %vm64_vm4, %v65_v26, %v63_v27 }
 0x14d   :  { %v68_v29 = vadd.f32 1e-06, %v66_v28 }
 0x14f   :  { %124 = vrcp.f32 %v68_v29 }
 0x155   :  { %v123_v32 = vpop.eup %122 }
 0x156   :  { %v83_v34 = vmul.f32 %v123_v32, %v81_v31 }
 0x158   :  { %v91_v36 = vadd.f32 %v113_v33, %v83_v34 }
 0x159   :  { %v125_v37 = vpop.eup %124 }
 0x15a   :  { %v84_v38 = vmul.f32 %v125_v37, %v82_v35  ;;  %93 = vst.msk [vmem:[#allocation5] sm:$0xff] %vm31_vm0, %v91_v36 }
 0x15c   :  { %v92_v39 = vadd.f32 %v113_v33, %v84_v38 }
 0x15e   :  { %94 = vst.msk [vmem:[#allocation5 + $0x8] sm:$0xff] %vm31_vm0, %v92_v39 }
 0x15f   :  { %159 = shalt.err (!%p156_p12)
}
 0x160   :  { %s160_s5 = scalar_lea.hbm %s243_s3, 256 }
 0x161   :  { %p161_p13 = scmp.ne.s32.totalorder %s243_s3, %s160_s5  ;;  %p164_p0 = scmp.lt.u32.totalorder %s160_s5, %s243_s3 }
 0x163   :  { %p166_p1 = pnand %p164_p0, %p161_p13 }
 0x165   :  { %169 = shalt.err (!%p166_p1)
}
 0x166   :  { %106 = dma.vmem_to_hbm [thread:$0]  %s101_s30, 256, %s243_s3, [#allocation4], %s175_s22, %s175_s22, %s176_s23  }
 0x167   :  { %172 = dma.done.wait [#allocation4], 256  }
 0x168   :  { %173 = vsyncadd [#allocation4], 4294967040 }
 0x169   :  { %110 = vsyncpa [#allocation3], 1 }
 0x16a   :  { %111 = vsyncpa [#allocation4], 1 }

</bundles_post_ra>
